<compile_context>
chip_gen: v6e
topology: v6e:2x2x1
jax: 0.10.0
libtpu: 0.0.40
codegen_flags: <defaults>
</compile_context>

<pallas_src>
import functools

import numpy as np
import jax
import jax.numpy as jnp
from jax import lax
from jax.experimental import pallas as pl
from jax.experimental.pallas import tpu as pltpu

# Fixed (non-learnable) Sobel kernels from L_gradient.__init__ (reference only).
SOBEL_X = ((-1.0, 0.0, 1.0), (-2.0, 0.0, 2.0), (-1.0, 0.0, 1.0))
SOBEL_Y = ((-1.0, -2.0, -1.0), (0.0, 0.0, 0.0), (1.0, 2.0, 1.0))


# ----------------------------- Pallas kernel ------------------------------ #

def _base_loss_kernel(fused_ref, base_ref, out_ref,
                      acc_ref, cdf_ref, ctf_ref, cdb_ref, ctb_ref,
                      *, int_ratio, grad_ratio, color_ratio, eps,
                      valid_rows, padded):
    h = pl.program_id(1)
    nh = pl.num_programs(1)
    _, th, w = fused_ref.shape          # (C=3, TH, W) — batch dim squeezed

    # Channel loads; accumulate in f32 regardless of the HBM-side dtype.
    fr = fused_ref[0].astype(jnp.float32)
    fg = fused_ref[1].astype(jnp.float32)
    fb = fused_ref[2].astype(jnp.float32)
    br = base_ref[0].astype(jnp.float32)
    bg = base_ref[1].astype(jnp.float32)
    bb = base_ref[2].astype(jnp.float32)

    fy = 0.299 * fr + 0.587 * fg + 0.114 * fb          # (TH, W)
    by = 0.299 * br + 0.587 * bg + 0.114 * bb

    # -- intensity: L1 on luminance ----------------------------------------
    int_map = jnp.abs(fy - by)

    # -- color: 1 - cosine, single rsqrt on the squared-norm product --------
    dot = fr * br + fg * bg + fb * bb
    nf2 = fr * fr + fg * fg + fb * fb
    nb2 = br * br + bg * bg + bb * bb
    color_map = 1.0 - dot * lax.rsqrt(jnp.maximum(nf2 * nb2, eps * eps))

    # -- Sobel, horizontal separable pass (lane rolls, (1, W) edge masks) ---
    col = lax.broadcasted_iota(jnp.int32, (1, w), 1)
    is_left = col == 0
    is_right = col == (w - 1)

    def hpass(x):
        xl = jnp.where(is_left, x, pltpu.roll(x, 1, axis=1))        # x[:, c-1]
        xr = jnp.where(is_right, x, pltpu.roll(x, w - 1, axis=1))   # x[:, c+1]
        return xr - xl, xl + (x + x) + xr       # d = [-1,0,1], t = [1,2,1]

    df, tf = hpass(fy)
    db, tb = hpass(by)

    # -- first row-tile of this image: reset acc, replicate-init carries ----
    @pl.when(h == 0)
    def _():
        acc_ref[...] = jnp.zeros_like(acc_ref)
        cdf_ref[...] = jnp.broadcast_to(df[0:1, :], (2, w))
        ctf_ref[...] = jnp.broadcast_to(tf[0:1, :], (2, w))
        cdb_ref[...] = jnp.broadcast_to(db[0:1, :], (2, w))
        ctb_ref[...] = jnp.broadcast_to(tb[0:1, :], (2, w))

    # -- Sobel, vertical pass via aligned sublane rolls (rows lagged by 1) --
    # Tile row r holds the gradient of image row (h*TH + r - 1).  Rows 0/1 are
    # wrap-around garbage; they are replaced by the carry-based fix below.
    df_m1 = pltpu.roll(df, 1, axis=0)
    df_m2 = pltpu.roll(df, 2, axis=0)
    tf_m2 = pltpu.roll(tf, 2, axis=0)
    db_m1 = pltpu.roll(db, 1, axis=0)
    db_m2 = pltpu.roll(db, 2, axis=0)
    tb_m2 = pltpu.roll(tb, 2, axis=0)

    def gdiff(gxf, gyf, gxb, gyb):
        return (jnp.abs(jnp.abs(gxf) - jnp.abs(gxb))
                + jnp.abs(jnp.abs(gyf) - jnp.abs(gyb)))

    grad_map = gdiff(df_m2 + (df_m1 + df_m1) + df, tf - tf_m2,
                     db_m2 + (db_m1 + db_m1) + db, tb - tb_m2)

    ic_map = int_ratio * int_map + color_ratio * color_map
    g_map = grad_ratio * grad_map
    if padded:
        # H was edge-padded up to a multiple of 8 in the wrapper; mask rows.
        row = h * th + lax.broadcasted_iota(jnp.int32, (th, 1), 0)
        ic_map = jnp.where(row < valid_rows, ic_map, 0.0)
        g_map = jnp.where(row <= valid_rows, g_map, 0.0)   # grad rows lagged by 1
    total_map = ic_map + g_map

    # -- fold into the (8, W) accumulator with aligned VPU adds only --------
    folded = total_map[0:8, :]
    for i in range(1, th // 8):
        folded = folded + total_map[i * 8:(i + 1) * 8, :]
    acc_ref[...] += folded

    # -- fix the two lagged boundary rows from the (2, W) d/t carries -------
    cdf0, cdf1 = cdf_ref[0:1, :], cdf_ref[1:2, :]
    ctf0, ctf1 = ctf_ref[0:1, :], ctf_ref[1:2, :]
    cdb0, cdb1 = cdb_ref[0:1, :], cdb_ref[1:2, :]
    ctb0, ctb1 = ctb_ref[0:1, :], ctb_ref[1:2, :]
    df0, df1 = df[0:1, :], df[1:2, :]
    tf0, tf1 = tf[0:1, :], tf[1:2, :]
    db0, db1 = db[0:1, :], db[1:2, :]
    tb0, tb1 = tb[0:1, :], tb[1:2, :]

    c0 = gdiff(cdf0 + (cdf1 + cdf1) + df0, tf0 - ctf0,
               cdb0 + (cdb1 + cdb1) + db0, tb0 - ctb0)
    c0 = c0 * jnp.where(h == 0, 0.0, 1.0)          # image row -1 does not exist
    c1 = gdiff(cdf1 + (df0 + df0) + df1, tf1 - ctf1,
               cdb1 + (db0 + db0) + db1, tb1 - ctb1)
    correct01 = jnp.concatenate([c0, c1], axis=0)            # (2, W)
    acc_ref[0:2, :] += grad_ratio * (correct01 - grad_map[0:2, :])

    # -- carry the last two d/t rows for the next tile / the finalizer ------
    cdf_ref[...] = df_m2[0:2, :]          # = rows TH-2, TH-1 of this tile
    ctf_ref[...] = tf_m2[0:2, :]
    cdb_ref[...] = db_m2[0:2, :]
    ctb_ref[...] = tb_m2[0:2, :]

    # -- last tile: bottom image row + the single cross-lane reduction ------
    @pl.when(h == nh - 1)
    def _():
        total = jnp.sum(acc_ref[...])
        if not padded:
            # Gradient of image row H-1 (replicate padding below), recomputed
            # only from the (2, W) carries.
            gxf = cdf_ref[0:1, :] + 3.0 * cdf_ref[1:2, :]
            gyf = ctf_ref[1:2, :] - ctf_ref[0:1, :]
            gxb = cdb_ref[0:1, :] + 3.0 * cdb_ref[1:2, :]
            gyb = ctb_ref[1:2, :] - ctb_ref[0:1, :]
            total = total + grad_ratio * jnp.sum(gdiff(gxf, gyf, gxb, gyb))
        out_ref[...] = jnp.broadcast_to(total, out_ref.shape)


# ------------------------------ wrapper ------------------------------------ #

def _tpu_budgets():
    """(max tile elements, vmem_limit_bytes) tuned per TPU generation."""
    try:
        kind = jax.devices()[0].device_kind.lower()
    except Exception:
        kind = ""
    if ("v5" in kind) or ("v6" in kind):
        # 128 MiB VMEM parts: larger tiles -> fewer grid steps, longer DMA bursts.
        return 256 * 1024, 64 * 1024 * 1024
    # v7x (64 MiB VMEM) or unknown: moderate tiles, capped scoped VMEM.
    return 128 * 1024, 48 * 1024 * 1024


def _pick_tile_rows(h_pad, w, max_elems):
    """Largest multiple-of-8 divisor of h_pad with TH*W under the budget."""
    best = 8                    # 8 always divides h_pad; never fall back to TH=H
    for th in range(8, h_pad + 1, 8):
        if h_pad % th == 0 and th * w <= max_elems:
            best = th
    return best


def fusion_modulated_loss_base(image_fused, fusion_base, *,
                               int_ratio=1.0, grad_ratio=2.0, color_ratio=10.0,
                               tile_rows=None):
    N, C, H, W = image_fused.shape
    assert C == 3 and H >= 2
    assert fusion_base.shape == image_fused.shape

    max_elems, vmem_limit = _tpu_budgets()

    # Robust tiling: edge-pad H up to a multiple of 8; mask padded rows in-kernel.
    h_pad = ((H + 7) // 8) * 8
    padded = h_pad != H
    if padded:
        pads = ((0, 0), (0, 0), (0, h_pad - H), (0, 0))
        image_fused = jnp.pad(image_fused, pads, mode="edge")
        fusion_base = jnp.pad(fusion_base, pads, mode="edge")

    th = tile_rows if tile_rows is not None else _pick_tile_rows(h_pad, W, max_elems)
    assert h_pad % th == 0 and th % 8 == 0
    nh = h_pad // th

    kernel = functools.partial(
        _base_loss_kernel,
        int_ratio=float(int_ratio), grad_ratio=float(grad_ratio),
        color_ratio=float(color_ratio), eps=1e-12,
        valid_rows=int(H), padded=bool(padded))

    itemsize = jnp.dtype(image_fused.dtype).itemsize
    cost = pl.CostEstimate(
        flops=int(80 * N * h_pad * W),
        transcendentals=int(N * h_pad * W),
        bytes_accessed=int(2 * N * C * h_pad * W * itemsize + N * 8 * 128 * 4))

    partials = pl.pallas_call(
        kernel,
        out_shape=jax.ShapeDtypeStruct((N, 8, 128), jnp.float32),
        grid_spec=pltpu.PrefetchScalarGridSpec(
            num_scalar_prefetch=0,
            grid=(N, nh),
            in_specs=[
                pl.BlockSpec((pl.Squeezed(), C, th, W),
                             lambda b, h: (b, 0, h, 0)),
                pl.BlockSpec((pl.Squeezed(), C, th, W),
                             lambda b, h: (b, 0, h, 0)),
            ],
            out_specs=pl.BlockSpec((1, 8, 128), lambda b, h: (b, 0, 0)),
            scratch_shapes=[
                pltpu.VMEM((8, W), jnp.float32),   # vector partial-sum acc
                pltpu.VMEM((2, W), jnp.float32),   # fused d-row carry
                pltpu.VMEM((2, W), jnp.float32),   # fused t-row carry
                pltpu.VMEM((2, W), jnp.float32),   # base  d-row carry
                pltpu.VMEM((2, W), jnp.float32),   # base  t-row carry
            ]),
        compiler_params=pltpu.CompilerParams(
            dimension_semantics=("parallel", "arbitrary"),
            vmem_limit_bytes=vmem_limit),
        cost_estimate=cost,
    )(image_fused, fusion_base)

    # each (1, 8, 128) block holds the per-image weighted sum (splatted)
    return 10.0 * jnp.sum(partials[:, 0, 0]) / (N * H * W)


def fusion_modulated_loss(image_A, image_B, image_fused, g_label,
                          image_Seg_Label, Fusion_Base, text_seg_list,
                          int_ratio=1, grad_ratio=2, color_ratio=10,
                          enhance=False):
    """Mirrors fusion_modulated_loss.forward.

    Branch selection (base vs. enhance, i.e. `max(image_Seg_Label) == 0` in the
    PyTorch forward) is a *static* Python flag so the whole function stays
    jittable — no device->host sync per call.
    """
    del image_A, image_B, g_label, image_Seg_Label, text_seg_list  # base branch
    if enhance:
        # TODO(synk): enhance branch (per-batch ignore-class cross-entropy,
        # data-dependent boolean-mask means, gaussian blur) has no clean
        # static-shape Pallas mapping.
        raise NotImplementedError("enhance branch not implemented")
    return fusion_modulated_loss_base(
        image_fused, Fusion_Base, int_ratio=int_ratio,
        grad_ratio=grad_ratio, color_ratio=color_ratio)


# ------------------------- pure-JAX reference ------------------------------ #

def _reference_base_loss(image_fused, fusion_base,
                         int_ratio=1.0, grad_ratio=2.0, color_ratio=10.0):
    def to_y(x):
        return 0.299 * x[:, 0:1] + 0.587 * x[:, 1:2] + 0.114 * x[:, 2:3]

    fy = to_y(image_fused)
    by = to_y(fusion_base)
    loss_int = jnp.mean(jnp.abs(fy - by))

    def sobel(x):  # (N,1,H,W)
        xp = jnp.pad(x, ((0, 0), (0, 0), (1, 1), (1, 1)), mode="edge")
        kx = jnp.asarray(SOBEL_X, jnp.float32)[None, None]
        ky = jnp.asarray(SOBEL_Y, jnp.float32)[None, None]
        gx = lax.conv_general_dilated(xp, kx, (1, 1), "VALID")
        gy = lax.conv_general_dilated(xp, ky, (1, 1), "VALID")
        return jnp.abs(gx), jnp.abs(gy)

    gfx, gfy = sobel(fy)
    gbx, gby = sobel(by)
    loss_grad = jnp.mean(jnp.abs(gfx - gbx)) + jnp.mean(jnp.abs(gfy - gby))

    eps = 1e-12
    fn = image_fused / jnp.maximum(
        jnp.linalg.norm(image_fused, axis=1, keepdims=True), eps)
    bn = fusion_base / jnp.maximum(
        jnp.linalg.norm(fusion_base, axis=1, keepdims=True), eps)
    loss_color = jnp.mean(1.0 - jnp.sum(fn * bn, axis=1))

    return 10.0 * (int_ratio * loss_int + grad_ratio * loss_grad
                   + color_ratio * loss_color)


# -------------------------------- main -------------------------------------- #

if __name__ == "__main__":
    key = jax.random.PRNGKey(0)
    kA, kB, kF, kG, kBase = jax.random.split(key, 5)
    N, C, H, W = 2, 3, 32, 128

    image_A = jax.random.uniform(kA, (N, C, H, W), jnp.float32)
    image_B = jax.random.uniform(kB, (N, C, H, W), jnp.float32)
    image_fused = jax.random.uniform(kF, (N, C, H, W), jnp.float32)
    Fusion_Base = jax.random.uniform(kBase, (N, C, H, W), jnp.float32)
    g_label = jax.random.normal(kG, (N, 9, H, W), jnp.float32)
    image_Seg_Label = jnp.zeros((N, 1, H, W), jnp.int32)   # base branch
    text_seg_list = [[0], [0]]

    ref = jax.block_until_ready(_reference_base_loss(image_fused, Fusion_Base))

    # 1) multi-tile path (exercises the d/t row carries + lagged-row fixups).
    loss_tiled = jax.block_until_ready(
        fusion_modulated_loss_base(image_fused, Fusion_Base, tile_rows=8))
    np.testing.assert_allclose(np.asarray(loss_tiled), np.asarray(ref),
                               rtol=2e-4, atol=2e-4)

    # 2) jitted public entry point (static branch flag, auto tile pick).
    jitted = jax.jit(lambda f, b: fusion_modulated_loss(
        image_A, image_B, f, g_label, image_Seg_Label, b, text_seg_list))
    loss = jax.block_until_ready(jitted(image_fused, Fusion_Base))
    np.testing.assert_allclose(np.asarray(loss), np.asarray(ref),
                               rtol=2e-4, atol=2e-4)

    # 3) ragged-H path (H not a multiple of 8 -> edge pad + in-kernel masking).
    H2 = 28
    fused2 = jax.random.uniform(kF, (N, C, H2, W), jnp.float32)
    base2 = jax.random.uniform(kBase, (N, C, H2, W), jnp.float32)
    ref2 = jax.block_until_ready(_reference_base_loss(fused2, base2))
    loss2 = jax.block_until_ready(
        fusion_modulated_loss_base(fused2, base2, tile_rows=8))
    np.testing.assert_allclose(np.asarray(loss2), np.asarray(ref2),
                               rtol=2e-4, atol=2e-4)

    print("KERNEL_OK")
</pallas_src>

<mosaic_0001>
module attributes {stable_mosaic.version = 11 : i64} {
  func.func @_base_loss_kernel(%arg0: i32, %arg1: i32, %arg2: memref<1x3x8x128xf32, #tpu.memory_space<vmem>>, %arg3: memref<1x3x8x128xf32, #tpu.memory_space<vmem>>, %arg4: memref<1x8x128xf32, #tpu.memory_space<vmem>>, %arg5: memref<8x128xf32, #tpu.memory_space<vmem>>, %arg6: memref<2x128xf32, #tpu.memory_space<vmem>>, %arg7: memref<2x128xf32, #tpu.memory_space<vmem>>, %arg8: memref<2x128xf32, #tpu.memory_space<vmem>>, %arg9: memref<2x128xf32, #tpu.memory_space<vmem>>) attributes {dimension_semantics = [#tpu.dimension_semantics<parallel>, #tpu.dimension_semantics<arbitrary>], iteration_bounds = array<i64: 2, 4>, scalar_prefetch = 0 : i64, scratch_operands = 5 : i64, tpu.core_type = #tpu.core_type<tc>, window_params = [{transform_indices = @transform_0, window_bounds = array<i64: 1, 3, 8, 128>}, {transform_indices = @transform_1, window_bounds = array<i64: 1, 3, 8, 128>}, {transform_indices = @transform_2, window_bounds = array<i64: 1, 8, 128>}]} {
    %c0 = arith.constant 0 : index
    %c0_0 = arith.constant 0 : index
    %c0_1 = arith.constant 0 : index
    %c0_2 = arith.constant 0 : index
    %0 = vector.load %arg2[%c0, %c0_0, %c0_1, %c0_2] : memref<1x3x8x128xf32, #tpu.memory_space<vmem>>, vector<1x1x8x128xf32>
    %1 = vector.shape_cast %0 : vector<1x1x8x128xf32> to vector<8x128xf32>
    %c0_3 = arith.constant 0 : index
    %c1 = arith.constant 1 : index
    %c0_4 = arith.constant 0 : index
    %c0_5 = arith.constant 0 : index
    %2 = vector.load %arg2[%c0_3, %c1, %c0_4, %c0_5] : memref<1x3x8x128xf32, #tpu.memory_space<vmem>>, vector<1x1x8x128xf32>
    %3 = vector.shape_cast %2 : vector<1x1x8x128xf32> to vector<8x128xf32>
    %c0_6 = arith.constant 0 : index
    %c2 = arith.constant 2 : index
    %c0_7 = arith.constant 0 : index
    %c0_8 = arith.constant 0 : index
    %4 = vector.load %arg2[%c0_6, %c2, %c0_7, %c0_8] : memref<1x3x8x128xf32, #tpu.memory_space<vmem>>, vector<1x1x8x128xf32>
    %5 = vector.shape_cast %4 : vector<1x1x8x128xf32> to vector<8x128xf32>
    %c0_9 = arith.constant 0 : index
    %c0_10 = arith.constant 0 : index
    %c0_11 = arith.constant 0 : index
    %c0_12 = arith.constant 0 : index
    %6 = vector.load %arg3[%c0_9, %c0_10, %c0_11, %c0_12] : memref<1x3x8x128xf32, #tpu.memory_space<vmem>>, vector<1x1x8x128xf32>
    %7 = vector.shape_cast %6 : vector<1x1x8x128xf32> to vector<8x128xf32>
    %c0_13 = arith.constant 0 : index
    %c1_14 = arith.constant 1 : index
    %c0_15 = arith.constant 0 : index
    %c0_16 = arith.constant 0 : index
    %8 = vector.load %arg3[%c0_13, %c1_14, %c0_15, %c0_16] : memref<1x3x8x128xf32, #tpu.memory_space<vmem>>, vector<1x1x8x128xf32>
    %9 = vector.shape_cast %8 : vector<1x1x8x128xf32> to vector<8x128xf32>
    %c0_17 = arith.constant 0 : index
    %c2_18 = arith.constant 2 : index
    %c0_19 = arith.constant 0 : index
    %c0_20 = arith.constant 0 : index
    %10 = vector.load %arg3[%c0_17, %c2_18, %c0_19, %c0_20] : memref<1x3x8x128xf32, #tpu.memory_space<vmem>>, vector<1x1x8x128xf32>
    %11 = vector.shape_cast %10 : vector<1x1x8x128xf32> to vector<8x128xf32>
    %cst = arith.constant 2.990000e-01 : f32
    %12 = vector.broadcast %cst : f32 to vector<8x128xf32>
    %13 = arith.mulf %12, %1 : vector<8x128xf32>
    %cst_21 = arith.constant 5.870000e-01 : f32
    %14 = vector.broadcast %cst_21 : f32 to vector<8x128xf32>
    %15 = arith.mulf %14, %3 : vector<8x128xf32>
    %16 = arith.addf %13, %15 : vector<8x128xf32>
    %cst_22 = arith.constant 1.140000e-01 : f32
    %17 = vector.broadcast %cst_22 : f32 to vector<8x128xf32>
    %18 = arith.mulf %17, %5 : vector<8x128xf32>
    %19 = arith.addf %16, %18 : vector<8x128xf32>
    %cst_23 = arith.constant 2.990000e-01 : f32
    %20 = vector.broadcast %cst_23 : f32 to vector<8x128xf32>
    %21 = arith.mulf %20, %7 : vector<8x128xf32>
    %cst_24 = arith.constant 5.870000e-01 : f32
    %22 = vector.broadcast %cst_24 : f32 to vector<8x128xf32>
    %23 = arith.mulf %22, %9 : vector<8x128xf32>
    %24 = arith.addf %21, %23 : vector<8x128xf32>
    %cst_25 = arith.constant 1.140000e-01 : f32
    %25 = vector.broadcast %cst_25 : f32 to vector<8x128xf32>
    %26 = arith.mulf %25, %11 : vector<8x128xf32>
    %27 = arith.addf %24, %26 : vector<8x128xf32>
    %28 = arith.subf %19, %27 : vector<8x128xf32>
    %29 = math.absf %28 : vector<8x128xf32>
    %30 = arith.mulf %1, %7 : vector<8x128xf32>
    %31 = arith.mulf %3, %9 : vector<8x128xf32>
    %32 = arith.addf %30, %31 : vector<8x128xf32>
    %33 = arith.mulf %5, %11 : vector<8x128xf32>
    %34 = arith.addf %32, %33 : vector<8x128xf32>
    %35 = arith.mulf %1, %1 : vector<8x128xf32>
    %36 = arith.mulf %3, %3 : vector<8x128xf32>
    %37 = arith.addf %35, %36 : vector<8x128xf32>
    %38 = arith.mulf %5, %5 : vector<8x128xf32>
    %39 = arith.addf %37, %38 : vector<8x128xf32>
    %40 = arith.mulf %7, %7 : vector<8x128xf32>
    %41 = arith.mulf %9, %9 : vector<8x128xf32>
    %42 = arith.addf %40, %41 : vector<8x128xf32>
    %43 = arith.mulf %11, %11 : vector<8x128xf32>
    %44 = arith.addf %42, %43 : vector<8x128xf32>
    %45 = arith.mulf %39, %44 : vector<8x128xf32>
    %cst_26 = arith.constant 1.000000e-24 : f32
    %46 = vector.broadcast %cst_26 : f32 to vector<8x128xf32>
    %47 = arith.maximumf %45, %46 : vector<8x128xf32>
    %48 = math.rsqrt %47 : vector<8x128xf32>
    %49 = arith.mulf %34, %48 : vector<8x128xf32>
    %cst_27 = arith.constant 1.000000e+00 : f32
    %50 = vector.broadcast %cst_27 : f32 to vector<8x128xf32>
    %51 = arith.subf %50, %49 : vector<8x128xf32>
    %52 = tpu.iota {dimensions = array<i32: 1>} : vector<1x128xi32>
    %c0_i32 = arith.constant 0 : i32
    %53 = vector.broadcast %c0_i32 : i32 to vector<1x128xi32>
    %54 = arith.cmpi eq, %52, %53 : vector<1x128xi32>
    %c127_i32 = arith.constant 127 : i32
    %55 = vector.broadcast %c127_i32 : i32 to vector<1x128xi32>
    %56 = arith.cmpi eq, %52, %55 : vector<1x128xi32>
    %c1_i32 = arith.constant 1 : i32
    %57 = tpu.dynamic_rotate %19 by %c1_i32 dim 1 : vector<8x128xf32>, i32 -> vector<8x128xf32>
    %58 = vector.shape_cast %54 : vector<1x128xi1> to vector<1x128xi1>
    %59 = vector.broadcast %58 : vector<1x128xi1> to vector<8x128xi1>
    %60 = arith.select %59, %19, %57 : vector<8x128xi1>, vector<8x128xf32>
    %c127_i32_28 = arith.constant 127 : i32
    %61 = tpu.dynamic_rotate %19 by %c127_i32_28 dim 1 : vector<8x128xf32>, i32 -> vector<8x128xf32>
    %62 = vector.shape_cast %56 : vector<1x128xi1> to vector<1x128xi1>
    %63 = vector.broadcast %62 : vector<1x128xi1> to vector<8x128xi1>
    %64 = arith.select %63, %19, %61 : vector<8x128xi1>, vector<8x128xf32>
    %65 = arith.subf %64, %60 : vector<8x128xf32>
    %66 = arith.addf %19, %19 : vector<8x128xf32>
    %67 = arith.addf %60, %66 : vector<8x128xf32>
    %68 = arith.addf %67, %64 : vector<8x128xf32>
    %c1_i32_29 = arith.constant 1 : i32
    %69 = tpu.dynamic_rotate %27 by %c1_i32_29 dim 1 : vector<8x128xf32>, i32 -> vector<8x128xf32>
    %70 = vector.shape_cast %54 : vector<1x128xi1> to vector<1x128xi1>
    %71 = vector.broadcast %70 : vector<1x128xi1> to vector<8x128xi1>
    %72 = arith.select %71, %27, %69 : vector<8x128xi1>, vector<8x128xf32>
    %c127_i32_30 = arith.constant 127 : i32
    %73 = tpu.dynamic_rotate %27 by %c127_i32_30 dim 1 : vector<8x128xf32>, i32 -> vector<8x128xf32>
    %74 = vector.shape_cast %56 : vector<1x128xi1> to vector<1x128xi1>
    %75 = vector.broadcast %74 : vector<1x128xi1> to vector<8x128xi1>
    %76 = arith.select %75, %27, %73 : vector<8x128xi1>, vector<8x128xf32>
    %77 = arith.subf %76, %72 : vector<8x128xf32>
    %78 = arith.addf %27, %27 : vector<8x128xf32>
    %79 = arith.addf %72, %78 : vector<8x128xf32>
    %80 = arith.addf %79, %76 : vector<8x128xf32>
    %c0_i32_31 = arith.constant 0 : i32
    %81 = arith.cmpi eq, %arg1, %c0_i32_31 : i32
    %82 = arith.extui %81 : i1 to i32
    %c0_i32_32 = arith.constant 0 : i32
    %83 = arith.cmpi ne, %82, %c0_i32_32 : i32
    scf.if %83 {
      %cst_78 = arith.constant 0.000000e+00 : f32
      %191 = vector.broadcast %cst_78 : f32 to vector<8x128xf32>
      %c0_79 = arith.constant 0 : index
      %c0_80 = arith.constant 0 : index
      %192 = vector.load %arg5[%c0_79, %c0_80] : memref<8x128xf32, #tpu.memory_space<vmem>>, vector<8x128xf32>
      tpu.vector_store %arg5[%c0_79, %c0_80], %191 {strides = array<i32>} : memref<8x128xf32, #tpu.memory_space<vmem>>, vector<8x128xf32>,
      %193 = vector.extract_strided_slice %65 {offsets = [0, 0], sizes = [1, 128], strides = [1, 1]} : vector<8x128xf32> to vector<1x128xf32>
      %194 = vector.shape_cast %193 : vector<1x128xf32> to vector<1x128xf32>
      %195 = vector.broadcast %194 : vector<1x128xf32> to vector<2x128xf32>
      %c0_81 = arith.constant 0 : index
      %c0_82 = arith.constant 0 : index
      %196 = vector.load %arg6[%c0_81, %c0_82] : memref<2x128xf32, #tpu.memory_space<vmem>>, vector<2x128xf32>
      tpu.vector_store %arg6[%c0_81, %c0_82], %195 {strides = array<i32>} : memref<2x128xf32, #tpu.memory_space<vmem>>, vector<2x128xf32>,
      %197 = vector.extract_strided_slice %68 {offsets = [0, 0], sizes = [1, 128], strides = [1, 1]} : vector<8x128xf32> to vector<1x128xf32>
      %198 = vector.shape_cast %197 : vector<1x128xf32> to vector<1x128xf32>
      %199 = vector.broadcast %198 : vector<1x128xf32> to vector<2x128xf32>
      %c0_83 = arith.constant 0 : index
      %c0_84 = arith.constant 0 : index
      %200 = vector.load %arg7[%c0_83, %c0_84] : memref<2x128xf32, #tpu.memory_space<vmem>>, vector<2x128xf32>
      tpu.vector_store %arg7[%c0_83, %c0_84], %199 {strides = array<i32>} : memref<2x128xf32, #tpu.memory_space<vmem>>, vector<2x128xf32>,
      %201 = vector.extract_strided_slice %77 {offsets = [0, 0], sizes = [1, 128], strides = [1, 1]} : vector<8x128xf32> to vector<1x128xf32>
      %202 = vector.shape_cast %201 : vector<1x128xf32> to vector<1x128xf32>
      %203 = vector.broadcast %202 : vector<1x128xf32> to vector<2x128xf32>
      %c0_85 = arith.constant 0 : index
      %c0_86 = arith.constant 0 : index
      %204 = vector.load %arg8[%c0_85, %c0_86] : memref<2x128xf32, #tpu.memory_space<vmem>>, vector<2x128xf32>
      tpu.vector_store %arg8[%c0_85, %c0_86], %203 {strides = array<i32>} : memref<2x128xf32, #tpu.memory_space<vmem>>, vector<2x128xf32>,
      %205 = vector.extract_strided_slice %80 {offsets = [0, 0], sizes = [1, 128], strides = [1, 1]} : vector<8x128xf32> to vector<1x128xf32>
      %206 = vector.shape_cast %205 : vector<1x128xf32> to vector<1x128xf32>
      %207 = vector.broadcast %206 : vector<1x128xf32> to vector<2x128xf32>
      %c0_87 = arith.constant 0 : index
      %c0_88 = arith.constant 0 : index
      %208 = vector.load %arg9[%c0_87, %c0_88] : memref<2x128xf32, #tpu.memory_space<vmem>>, vector<2x128xf32>
      tpu.vector_store %arg9[%c0_87, %c0_88], %207 {strides = array<i32>} : memref<2x128xf32, #tpu.memory_space<vmem>>, vector<2x128xf32>,
    } else {
    }
    %c1_i32_33 = arith.constant 1 : i32
    %84 = tpu.dynamic_rotate %65 by %c1_i32_33 dim 0 : vector<8x128xf32>, i32 -> vector<8x128xf32>
    %c2_i32 = arith.constant 2 : i32
    %85 = tpu.dynamic_rotate %65 by %c2_i32 dim 0 : vector<8x128xf32>, i32 -> vector<8x128xf32>
    %c2_i32_34 = arith.constant 2 : i32
    %86 = tpu.dynamic_rotate %68 by %c2_i32_34 dim 0 : vector<8x128xf32>, i32 -> vector<8x128xf32>
    %c1_i32_35 = arith.constant 1 : i32
    %87 = tpu.dynamic_rotate %77 by %c1_i32_35 dim 0 : vector<8x128xf32>, i32 -> vector<8x128xf32>
    %c2_i32_36 = arith.constant 2 : i32
    %88 = tpu.dynamic_rotate %77 by %c2_i32_36 dim 0 : vector<8x128xf32>, i32 -> vector<8x128xf32>
    %c2_i32_37 = arith.constant 2 : i32
    %89 = tpu.dynamic_rotate %80 by %c2_i32_37 dim 0 : vector<8x128xf32>, i32 -> vector<8x128xf32>
    %90 = arith.addf %84, %84 : vector<8x128xf32>
    %91 = arith.addf %85, %90 : vector<8x128xf32>
    %92 = arith.addf %91, %65 : vector<8x128xf32>
    %93 = arith.subf %68, %86 : vector<8x128xf32>
    %94 = arith.addf %87, %87 : vector<8x128xf32>
    %95 = arith.addf %88, %94 : vector<8x128xf32>
    %96 = arith.addf %95, %77 : vector<8x128xf32>
    %97 = arith.subf %80, %89 : vector<8x128xf32>
    %98 = math.absf %92 : vector<8x128xf32>
    %99 = math.absf %96 : vector<8x128xf32>
    %100 = arith.subf %98, %99 : vector<8x128xf32>
    %101 = math.absf %100 : vector<8x128xf32>
    %102 = math.absf %93 : vector<8x128xf32>
    %103 = math.absf %97 : vector<8x128xf32>
    %104 = arith.subf %102, %103 : vector<8x128xf32>
    %105 = math.absf %104 : vector<8x128xf32>
    %106 = arith.addf %101, %105 : vector<8x128xf32>
    %cst_38 = arith.constant 1.000000e+00 : f32
    %107 = vector.broadcast %cst_38 : f32 to vector<8x128xf32>
    %108 = arith.mulf %107, %29 : vector<8x128xf32>
    %cst_39 = arith.constant 1.000000e+01 : f32
    %109 = vector.broadcast %cst_39 : f32 to vector<8x128xf32>
    %110 = arith.mulf %109, %51 : vector<8x128xf32>
    %111 = arith.addf %108, %110 : vector<8x128xf32>
    %cst_40 = arith.constant 2.000000e+00 : f32
    %112 = vector.broadcast %cst_40 : f32 to vector<8x128xf32>
    %113 = arith.mulf %112, %106 : vector<8x128xf32>
    %114 = arith.addf %111, %113 : vector<8x128xf32>
    %c0_41 = arith.constant 0 : index
    %c0_42 = arith.constant 0 : index
    %115 = vector.load %arg5[%c0_41, %c0_42] : memref<8x128xf32, #tpu.memory_space<vmem>>, vector<8x128xf32>
    %116 = arith.addf %115, %114 : vector<8x128xf32>
    %c0_43 = arith.constant 0 : index
    %c0_44 = arith.constant 0 : index
    %117 = vector.load %arg5[%c0_43, %c0_44] : memref<8x128xf32, #tpu.memory_space<vmem>>, vector<8x128xf32>
    tpu.vector_store %arg5[%c0_43, %c0_44], %116 {strides = array<i32>} : memref<8x128xf32, #tpu.memory_space<vmem>>, vector<8x128xf32>,
    %c0_45 = arith.constant 0 : index
    %c0_46 = arith.constant 0 : index
    %118 = vector.load %arg6[%c0_45, %c0_46] : memref<2x128xf32, #tpu.memory_space<vmem>>, vector<1x128xf32>
    %c1_47 = arith.constant 1 : index
    %c0_48 = arith.constant 0 : index
    %119 = vector.load %arg6[%c1_47, %c0_48] : memref<2x128xf32, #tpu.memory_space<vmem>>, vector<1x128xf32>
    %c0_49 = arith.constant 0 : index
    %c0_50 = arith.constant 0 : index
    %120 = vector.load %arg7[%c0_49, %c0_50] : memref<2x128xf32, #tpu.memory_space<vmem>>, vector<1x128xf32>
    %c1_51 = arith.constant 1 : index
    %c0_52 = arith.constant 0 : index
    %121 = vector.load %arg7[%c1_51, %c0_52] : memref<2x128xf32, #tpu.memory_space<vmem>>, vector<1x128xf32>
    %c0_53 = arith.constant 0 : index
    %c0_54 = arith.constant 0 : index
    %122 = vector.load %arg8[%c0_53, %c0_54] : memref<2x128xf32, #tpu.memory_space<vmem>>, vector<1x128xf32>
    %c1_55 = arith.constant 1 : index
    %c0_56 = arith.constant 0 : index
    %123 = vector.load %arg8[%c1_55, %c0_56] : memref<2x128xf32, #tpu.memory_space<vmem>>, vector<1x128xf32>
    %c0_57 = arith.constant 0 : index
    %c0_58 = arith.constant 0 : index
    %124 = vector.load %arg9[%c0_57, %c0_58] : memref<2x128xf32, #tpu.memory_space<vmem>>, vector<1x128xf32>
    %c1_59 = arith.constant 1 : index
    %c0_60 = arith.constant 0 : index
    %125 = vector.load %arg9[%c1_59, %c0_60] : memref<2x128xf32, #tpu.memory_space<vmem>>, vector<1x128xf32>
    %126 = vector.extract_strided_slice %65 {offsets = [0, 0], sizes = [1, 128], strides = [1, 1]} : vector<8x128xf32> to vector<1x128xf32>
    %127 = vector.extract_strided_slice %65 {offsets = [1, 0], sizes = [1, 128], strides = [1, 1]} : vector<8x128xf32> to vector<1x128xf32>
    %128 = vector.extract_strided_slice %68 {offsets = [0, 0], sizes = [1, 128], strides = [1, 1]} : vector<8x128xf32> to vector<1x128xf32>
    %129 = vector.extract_strided_slice %68 {offsets = [1, 0], sizes = [1, 128], strides = [1, 1]} : vector<8x128xf32> to vector<1x128xf32>
    %130 = vector.extract_strided_slice %77 {offsets = [0, 0], sizes = [1, 128], strides = [1, 1]} : vector<8x128xf32> to vector<1x128xf32>
    %131 = vector.extract_strided_slice %77 {offsets = [1, 0], sizes = [1, 128], strides = [1, 1]} : vector<8x128xf32> to vector<1x128xf32>
    %132 = vector.extract_strided_slice %80 {offsets = [0, 0], sizes = [1, 128], strides = [1, 1]} : vector<8x128xf32> to vector<1x128xf32>
    %133 = vector.extract_strided_slice %80 {offsets = [1, 0], sizes = [1, 128], strides = [1, 1]} : vector<8x128xf32> to vector<1x128xf32>
    %134 = arith.addf %119, %119 : vector<1x128xf32>
    %135 = arith.addf %118, %134 : vector<1x128xf32>
    %136 = arith.addf %135, %126 : vector<1x128xf32>
    %137 = arith.subf %128, %120 : vector<1x128xf32>
    %138 = arith.addf %123, %123 : vector<1x128xf32>
    %139 = arith.addf %122, %138 : vector<1x128xf32>
    %140 = arith.addf %139, %130 : vector<1x128xf32>
    %141 = arith.subf %132, %124 : vector<1x128xf32>
    %142 = math.absf %136 : vector<1x128xf32>
    %143 = math.absf %140 : vector<1x128xf32>
    %144 = arith.subf %142, %143 : vector<1x128xf32>
    %145 = math.absf %144 : vector<1x128xf32>
    %146 = math.absf %137 : vector<1x128xf32>
    %147 = math.absf %141 : vector<1x128xf32>
    %148 = arith.subf %146, %147 : vector<1x128xf32>
    %149 = math.absf %148 : vector<1x128xf32>
    %150 = arith.addf %145, %149 : vector<1x128xf32>
    %c0_i32_61 = arith.constant 0 : i32
    %151 = arith.cmpi eq, %arg1, %c0_i32_61 : i32
    %cst_62 = arith.constant 0.000000e+00 : f32
    %cst_63 = arith.constant 1.000000e+00 : f32
    %152 = arith.select %151, %cst_62, %cst_63 : f32
    %153 = vector.broadcast %152 : f32 to vector<1x128xf32>
    %154 = arith.mulf %150, %153 : vector<1x128xf32>
    %155 = arith.addf %126, %126 : vector<1x128xf32>
    %156 = arith.addf %119, %155 : vector<1x128xf32>
    %157 = arith.addf %156, %127 : vector<1x128xf32>
    %158 = arith.subf %129, %121 : vector<1x128xf32>
    %159 = arith.addf %130, %130 : vector<1x128xf32>
    %160 = arith.addf %123, %159 : vector<1x128xf32>
    %161 = arith.addf %160, %131 : vector<1x128xf32>
    %162 = arith.subf %133, %125 : vector<1x128xf32>
    %163 = math.absf %157 : vector<1x128xf32>
    %164 = math.absf %161 : vector<1x128xf32>
    %165 = arith.subf %163, %164 : vector<1x128xf32>
    %166 = math.absf %165 : vector<1x128xf32>
    %167 = math.absf %158 : vector<1x128xf32>
    %168 = math.absf %162 : vector<1x128xf32>
    %169 = arith.subf %167, %168 : vector<1x128xf32>
    %170 = math.absf %169 : vector<1x128xf32>
    %171 = arith.addf %166, %170 : vector<1x128xf32>
    %172 = tpu.concatenate %154, %171 in 0 : vector<1x128xf32>, vector<1x128xf32> -> vector<2x128xf32>
    %c0_64 = arith.constant 0 : index
    %c0_65 = arith.constant 0 : index
    %173 = vector.load %arg5[%c0_64, %c0_65] : memref<8x128xf32, #tpu.memory_space<vmem>>, vector<2x128xf32>
    %174 = vector.extract_strided_slice %106 {offsets = [0, 0], sizes = [2, 128], strides = [1, 1]} : vector<8x128xf32> to vector<2x128xf32>
    %175 = arith.subf %172, %174 : vector<2x128xf32>
    %cst_66 = arith.constant 2.000000e+00 : f32
    %176 = vector.broadcast %cst_66 : f32 to vector<2x128xf32>
    %177 = arith.mulf %176, %175 : vector<2x128xf32>
    %178 = arith.addf %173, %177 : vector<2x128xf32>
    %c0_67 = arith.constant 0 : index
    %c0_68 = arith.constant 0 : index
    %179 = vector.load %arg5[%c0_67, %c0_68] : memref<8x128xf32, #tpu.memory_space<vmem>>, vector<2x128xf32>
    tpu.vector_store %arg5[%c0_67, %c0_68], %178 {strides = array<i32>} : memref<8x128xf32, #tpu.memory_space<vmem>>, vector<2x128xf32>,
    %180 = vector.extract_strided_slice %85 {offsets = [0, 0], sizes = [2, 128], strides = [1, 1]} : vector<8x128xf32> to vector<2x128xf32>
    %c0_69 = arith.constant 0 : index
    %c0_70 = arith.constant 0 : index
    %181 = vector.load %arg6[%c0_69, %c0_70] : memref<2x128xf32, #tpu.memory_space<vmem>>, vector<2x128xf32>
    tpu.vector_store %arg6[%c0_69, %c0_70], %180 {strides = array<i32>} : memref<2x128xf32, #tpu.memory_space<vmem>>, vector<2x128xf32>,
    %182 = vector.extract_strided_slice %86 {offsets = [0, 0], sizes = [2, 128], strides = [1, 1]} : vector<8x128xf32> to vector<2x128xf32>
    %c0_71 = arith.constant 0 : index
    %c0_72 = arith.constant 0 : index
    %183 = vector.load %arg7[%c0_71, %c0_72] : memref<2x128xf32, #tpu.memory_space<vmem>>, vector<2x128xf32>
    tpu.vector_store %arg7[%c0_71, %c0_72], %182 {strides = array<i32>} : memref<2x128xf32, #tpu.memory_space<vmem>>, vector<2x128xf32>,
    %184 = vector.extract_strided_slice %88 {offsets = [0, 0], sizes = [2, 128], strides = [1, 1]} : vector<8x128xf32> to vector<2x128xf32>
    %c0_73 = arith.constant 0 : index
    %c0_74 = arith.constant 0 : index
    %185 = vector.load %arg8[%c0_73, %c0_74] : memref<2x128xf32, #tpu.memory_space<vmem>>, vector<2x128xf32>
    tpu.vector_store %arg8[%c0_73, %c0_74], %184 {strides = array<i32>} : memref<2x128xf32, #tpu.memory_space<vmem>>, vector<2x128xf32>,
    %186 = vector.extract_strided_slice %89 {offsets = [0, 0], sizes = [2, 128], strides = [1, 1]} : vector<8x128xf32> to vector<2x128xf32>
    %c0_75 = arith.constant 0 : index
    %c0_76 = arith.constant 0 : index
    %187 = vector.load %arg9[%c0_75, %c0_76] : memref<2x128xf32, #tpu.memory_space<vmem>>, vector<2x128xf32>
    tpu.vector_store %arg9[%c0_75, %c0_76], %186 {strides = array<i32>} : memref<2x128xf32, #tpu.memory_space<vmem>>, vector<2x128xf32>,
    %c3_i32 = arith.constant 3 : i32
    %188 = arith.cmpi eq, %arg1, %c3_i32 : i32
    %189 = arith.extui %188 : i1 to i32
    %c0_i32_77 = arith.constant 0 : i32
    %190 = arith.cmpi ne, %189, %c0_i32_77 : i32
    scf.if %190 {
      %c0_78 = arith.constant 0 : index
      %c0_79 = arith.constant 0 : index
      %191 = vector.load %arg5[%c0_78, %c0_79] : memref<8x128xf32, #tpu.memory_space<vmem>>, vector<8x128xf32>
      %192 = vector.shape_cast %191 : vector<8x128xf32> to vector<1x8x128xf32>
      %cst_80 = arith.constant dense<0.000000e+00> : vector<1xf32>
      %193 = vector.multi_reduction <add>, %192, %cst_80 [1, 2] : vector<1x8x128xf32> to vector<1xf32>
      %194 = vector.shape_cast %193 : vector<1xf32> to vector<1x1x1xf32>
      %195 = vector.extract %194[0, 0, 0] : f32 from vector<1x1x1xf32>
      %c0_81 = arith.constant 0 : index
      %c0_82 = arith.constant 0 : index
      %196 = vector.load %arg6[%c0_81, %c0_82] : memref<2x128xf32, #tpu.memory_space<vmem>>, vector<1x128xf32>
      %c1_83 = arith.constant 1 : index
      %c0_84 = arith.constant 0 : index
      %197 = vector.load %arg6[%c1_83, %c0_84] : memref<2x128xf32, #tpu.memory_space<vmem>>, vector<1x128xf32>
      %cst_85 = arith.constant 3.000000e+00 : f32
      %198 = vector.broadcast %cst_85 : f32 to vector<1x128xf32>
      %199 = arith.mulf %198, %197 : vector<1x128xf32>
      %200 = arith.addf %196, %199 : vector<1x128xf32>
      %c1_86 = arith.constant 1 : index
      %c0_87 = arith.constant 0 : index
      %201 = vector.load %arg7[%c1_86, %c0_87] : memref<2x128xf32, #tpu.memory_space<vmem>>, vector<1x128xf32>
      %c0_88 = arith.constant 0 : index
      %c0_89 = arith.constant 0 : index
      %202 = vector.load %arg7[%c0_88, %c0_89] : memref<2x128xf32, #tpu.memory_space<vmem>>, vector<1x128xf32>
      %203 = arith.subf %201, %202 : vector<1x128xf32>
      %c0_90 = arith.constant 0 : index
      %c0_91 = arith.constant 0 : index
      %204 = vector.load %arg8[%c0_90, %c0_91] : memref<2x128xf32, #tpu.memory_space<vmem>>, vector<1x128xf32>
      %c1_92 = arith.constant 1 : index
      %c0_93 = arith.constant 0 : index
      %205 = vector.load %arg8[%c1_92, %c0_93] : memref<2x128xf32, #tpu.memory_space<vmem>>, vector<1x128xf32>
      %cst_94 = arith.constant 3.000000e+00 : f32
      %206 = vector.broadcast %cst_94 : f32 to vector<1x128xf32>
      %207 = arith.mulf %206, %205 : vector<1x128xf32>
      %208 = arith.addf %204, %207 : vector<1x128xf32>
      %c1_95 = arith.constant 1 : index
      %c0_96 = arith.constant 0 : index
      %209 = vector.load %arg9[%c1_95, %c0_96] : memref<2x128xf32, #tpu.memory_space<vmem>>, vector<1x128xf32>
      %c0_97 = arith.constant 0 : index
      %c0_98 = arith.constant 0 : index
      %210 = vector.load %arg9[%c0_97, %c0_98] : memref<2x128xf32, #tpu.memory_space<vmem>>, vector<1x128xf32>
      %211 = arith.subf %209, %210 : vector<1x128xf32>
      %212 = math.absf %200 : vector<1x128xf32>
      %213 = math.absf %208 : vector<1x128xf32>
      %214 = arith.subf %212, %213 : vector<1x128xf32>
      %215 = math.absf %214 : vector<1x128xf32>
      %216 = math.absf %203 : vector<1x128xf32>
      %217 = math.absf %211 : vector<1x128xf32>
      %218 = arith.subf %216, %217 : vector<1x128xf32>
      %219 = math.absf %218 : vector<1x128xf32>
      %220 = arith.addf %215, %219 : vector<1x128xf32>
      %221 = vector.shape_cast %220 : vector<1x128xf32> to vector<1x1x128xf32>
      %cst_99 = arith.constant dense<0.000000e+00> : vector<1xf32>
      %222 = vector.multi_reduction <add>, %221, %cst_99 [1, 2] : vector<1x1x128xf32> to vector<1xf32>
      %223 = vector.shape_cast %222 : vector<1xf32> to vector<1x1x1xf32>
      %224 = vector.extract %223[0, 0, 0] : f32 from vector<1x1x1xf32>
      %cst_100 = arith.constant 2.000000e+00 : f32
      %225 = arith.mulf %cst_100, %224 : f32
      %226 = arith.addf %195, %225 : f32
      %227 = vector.broadcast %226 : f32 to vector<1x8x128xf32>
      %c0_101 = arith.constant 0 : index
      %c0_102 = arith.constant 0 : index
      %c0_103 = arith.constant 0 : index
      %228 = vector.load %arg4[%c0_101, %c0_102, %c0_103] : memref<1x8x128xf32, #tpu.memory_space<vmem>>, vector<1x8x128xf32>
      tpu.vector_store %arg4[%c0_101, %c0_102, %c0_103], %227 {strides = array<i32>} : memref<1x8x128xf32, #tpu.memory_space<vmem>>, vector<1x8x128xf32>,
    } else {
    }
    return
  }
  func.func @transform_0(%arg0: i32, %arg1: i32) -> (i32, i32, i32, i32) {
    %c0_i32 = arith.constant 0 : i32
    %c0_i32_0 = arith.constant 0 : i32
    %c0_i32_1 = arith.constant 0 : i32
    return %arg0, %c0_i32, %arg1, %c0_i32_0 : i32, i32, i32, i32
  }
  func.func @transform_1(%arg0: i32, %arg1: i32) -> (i32, i32, i32, i32) {
    %c0_i32 = arith.constant 0 : i32
    %c0_i32_0 = arith.constant 0 : i32
    %c0_i32_1 = arith.constant 0 : i32
    return %arg0, %c0_i32, %arg1, %c0_i32_0 : i32, i32, i32, i32
  }
  func.func @transform_2(%arg0: i32, %arg1: i32) -> (i32, i32, i32) {
    %c0_i32 = arith.constant 0 : i32
    %c0_i32_0 = arith.constant 0 : i32
    %c0_i32_1 = arith.constant 0 : i32
    return %arg0, %c0_i32, %c0_i32_0 : i32, i32, i32
  }
}

</mosaic_0001>

<bundles_post_ra>
// kernel: tpu_custom_call.1
= control target key start
LH: loop header
LB: loop body
LE: loop exit
PB: predicated region body
PF: predicated region fallthrough
CT: control target
= control target key end

     0   :  { %s1206_s0 = inlined_call_operand.hbm [shape: f32[2,3,32,128], index: 0, kind: input, shape index: {}]   ;;  %s1207_s1 = inlined_call_operand.hbm [shape: f32[2,3,32,128], index: 1, kind: input, shape index: {}]   ;;  %s1208_s2 = inlined_call_operand.hbm [shape: f32[2,8,128], index: 2, kind: output, shape index: {}]  }
   0x1   :  { %1215 = sst [smem:[#allocation22_spill]] %s1206_s0 }
   0x2   :  { %7 = vsyncpa [#allocation8], 0 }
   0x3   :  { %9 = vsyncpa [#allocation8 + $0x1], 0 }
   0x4   :  { %10 = vsyncpa [#allocation11], 0 }
   0x5   :  { %12 = vsyncpa [#allocation11 + $0x1], 0 }
   0x6   :  { %13 = vsyncpa [#allocation9], 0 }
   0x7   :  { %15 = vsyncpa [#allocation9 + $0x1], 0  ;;  %s940_s9 = smov 0   ;;  %s942_s10 = smov 0  }
   0x8   :  { %s944_s11 = smov 0   ;;  %s946_s12 = smov 0  }
   0x9   :  { %s948_s13 = smov 0   ;;  %s950_s14 = smov 0  }
   0xa   :  { %s952_s15 = smov 0   ;;  %s954_s16 = smov 0  }
   0xb   :  { %s956_s17 = smov 0   ;;  %s958_s18 = smov 0  }
   0xc   :  { %s960_s19 = smov 0  }
   0xd LB: > { %1216 = sst [smem:[#allocation16_spill]] %s894_s14  ;;  %s592_s20 = sadd.s32 4294967295, %s914_s19   ;;  %s914_s19 = sphi %s960_s19, %s21_s19   ;;  %s910_s18 = sphi %s958_s18, %s1235_s18   ;;  %s906_s17 = sphi %s956_s17, %s1234_s17   ;;  %s902_s16 = sphi %s954_s16, %s1233_s16   ;;  %s898_s15 = sphi %s952_s15, %s1232_s15   ;;  %s894_s14 = sphi %s950_s14, %s1231_s14   ;;  %s890_s13 = sphi %s948_s13, %s1240_s13   ;;  %s886_s12 = sphi %s946_s12, %s1239_s12   ;;  %s882_s11 = sphi %s944_s11, %s1238_s11   ;;  %s878_s10 = sphi %s942_s10, %s1237_s10   ;;  %s874_s9 = sphi %s940_s9, %s1236_s9  }
   0xe   : > { %1217 = sst [smem:[#allocation17_spill]] %s906_s17  ;;  %s593_s21 = sadd.s32 4294967294, %s914_s19  }
   0xf   : > { %1218 = sst [smem:[#allocation18_spill]] %s910_s18  ;;  %s30_s22 = sadd.s32 1, %s906_s17 }
  0x10   : > { %s33_s23 = sadd.s32 1, %s910_s18  ;;  %p31_p0 = scmp.ge.s32.totalorder %s30_s22, 4 }
  0x11   : > { %s42_s24 = sadd.s32 1, %s894_s14  ;;  %p49_p1 = scmp.ne.s32.totalorder %s894_s14, %s890_s13 }
  0x12   : > { %p50_p2 = scmp.eq.s32.totalorder %s914_s19, 0  ;;  %s1242_s22 = smov (%p31_p0, %s30_s22), 0 }
  0x13   : > { %1219 = sst [smem:[#allocation19_spill]] %s1242_s22  ;;  %s1244_s23 = smov (!%p31_p0, %s33_s23), %s910_s18 }
  0x14   : > { %s38_s25 = ssub.s32 %s906_s17, %s1242_s22  ;;  %p1006_p3 = por %p50_p2, %p49_p1 }
  0x15   : > { %p35_p4 = scmp.ge.s32.totalorder %s1244_s23, 2  ;;  %p55_p5 = scmp.ne.s32.totalorder %s890_s13, %s886_s12 }
  0x16   : > { %p56_p6 = scmp.eq.s32.totalorder %s592_s20, 0  ;;  %s96_s27 = sadd.s32 1, %s882_s11 }
  0x17   : > { %s1246_s23 = smov (%p35_p4, %s1244_s23), 0  ;;  %p106_p8 = scmp.ne.s32.totalorder %s882_s11, %s878_s10 }
  0x18   : > { %1221 = sst [smem:[#allocation20_spill]] %s1246_s23  ;;  %p1014_p7 = por %p56_p6, %p55_p5 }
  0x19   : > { %s37_s29 = ssub.s32 %s910_s18, %s1246_s23  ;;  %p107_p9 = scmp.eq.s32.totalorder %s592_s20, 7 }
  0x1a   : > { %s39_s30 = sor.u32 %s38_s25, %s37_s29  ;;  %p94_p10 = scmp.eq.s32.totalorder %s37_s29, 0 }
  0x1b   : > { %p40_p11 = scmp.eq.s32.totalorder %s39_s30, 0  ;;  %p1022_p12 = por %p107_p9, %p106_p8 }
  0x1c   : > { %s1027_s4 = scalar_select %p94_p10, %s882_s11, %s96_s27  }
  0x1d   : > { %s1030_s5 = scalar_select %p40_p11, %s894_s14, %s42_s24  }
  0x1e   : > { %p112_p13 = scmp.ne.s32.totalorder %s878_s10, %s874_s9  ;;  %p113_p0 = scmp.eq.s32.totalorder %s593_s21, 7 }
  0x1f   : > { %1224 = sst [smem:[#allocation21_spill]] %s1030_s5  ;;  %p636_p1 = scmp.lt.s32.totalorder %s914_s19, 8 }
  0x20   : > { %p1035_p2 = por %p113_p0, %p112_p13  ;;  %s1040_s7 = sand.u32 1, %s894_s14  }
  0x21   : > { %s1212_s8 = smul.u32 24, %s1040_s7  ;;  %p1046_p4 = pnand %p636_p1, %p1006_p3 }
  0x22   : > { %s611_s12 = smul.u32 12, %s910_s18  ;;  %s1227_s0 = sld [smem:[#allocation22_spill]] }
  0x23   : > { %s137_s24 = scalar_lea.vmem [#allocation7], %s1212_s8  ;;  %s134_s22 = scalar_lea.sflag [#allocation8], %s1040_s7 }
  0x24   : > { %s1051_s21 = sadd.s32 %s906_s17, %s611_s12  ;;  %s145_s25 = sshll.u32 %s137_s24, 4  ;;  %s146_s25 = int_to_ptr.vmem [resolvable:$true] %s145_s25 }
  0x25   : > { %s596_s27 = sshll.u32 %s1051_s21, 7  ;;  %p736_p3 = pneg %p1046_p4 }
  0x26   : > { %s747_s26 = scalar_lea.vmem %s146_s25, 384  ;;  %s916_s12 = smov [#allocation7]  }
  0x27   : > { %p748_p5 = scmp.ne.s32.totalorder %s146_s25, %s747_s26  ;;  %s752_s18 = sshll.u32 %s916_s12, 4  ;;  %s753_s18 = int_to_ptr.vmem [resolvable:$false] %s752_s18 }
  0x28   : > { %s144_s23 = scalar_lea.hbm %s1227_s0, %s596_s27  ;;  %s754_s8 = scalar_lea.vmem %s753_s18, 768 }
  0x29   : > { %p750_p6 = pnand %p748_p5, %p736_p3  ;;  %p755_p9 = scmp.lt.s32.totalorder %s146_s25, %s753_s18 }
  0x2a   : > { %p756_p10 = scmp.lt.s32.totalorder %s754_s8, %s747_s26 }
  0x2b   : > { %p751_p8 = pneg %p750_p6 }
  0x2c   : > { %p757_p11 = por %p756_p10, %p755_p9 }
  0x2e   : > { %p758_p13 = pnand %p757_p11, %p751_p8 }
  0x30   : > { %761 = shalt.err (!%p758_p13)
}
  0x31   : > { %s917_s21 = smov 512   ;;  %s918_s24 = smov 128  }
  0x32   : > { %s919_s29 = smov 8   ;;  %p598_p0 = scmp.ge.s32.totalorder %s914_s19, 1 }
  0x33   : > { %628 = dma.hbm_to_vmem [thread:$0]  (!%p1046_p4), %s144_s23, 384, %s146_s25, %s134_s22, %s917_s21, %s918_s24, %s919_s29  }
  0x34   : > { %p175_p1 = scmp.lt.s32.totalorder %s914_s19, 9  ;;  %s166_s26 = scalar_lea.hbm %s1207_s1, %s596_s27 }
  0x35   : > { %s1229_s12 = smul.u32 24, %s1040_s7  ;;  %s156_s5 = scalar_lea.sflag [#allocation11], %s1040_s7 }
  0x36   : > { %p1070_p5 = pnand %p598_p0, %p175_p1  ;;  %s920_s22 = smov [#allocation10]  }
  0x37   : > { %s159_s0 = scalar_lea.vmem [#allocation10], %s1229_s12  ;;  %s780_s23 = sshll.u32 %s920_s22, 4  ;;  %s781_s23 = int_to_ptr.vmem [resolvable:$false] %s780_s23 }
  0x38   : > { %s167_s17 = sshll.u32 %s159_s0, 4  ;;  %s782_s25 = scalar_lea.vmem %s781_s23, 768  ;;  %s168_s17 = int_to_ptr.vmem [resolvable:$true] %s167_s17 }
  0x39   : > { %s775_s14 = scalar_lea.vmem %s168_s17, 384  ;;  %p783_p10 = scmp.lt.s32.totalorder %s168_s17, %s781_s23 }
  0x3a   : > { %p776_p6 = scmp.ne.s32.totalorder %s168_s17, %s775_s14  ;;  %p784_p11 = scmp.lt.s32.totalorder %s782_s25, %s775_s14 }
  0x3c   : > { %p778_p8 = pnand %p776_p6, %p736_p3  ;;  %p785_p13 = por %p784_p11, %p783_p10 }
  0x3e   : > { %p779_p9 = pneg %p778_p8 }
  0x40   : > { %p786_p0 = pnand %p785_p13, %p779_p9 }
  0x42   : > { %789 = shalt.err (!%p786_p0)
}
  0x43   : > { %631 = dma.hbm_to_vmem [thread:$0]  (!%p1046_p4), %s166_s26, 384, %s168_s17, %s156_s5, %s917_s21, %s918_s24, %s919_s29  }
  0x44   : > { %179 = sbr.rel (%p1070_p5) target bundleno = 494 (0x1ee), region = 28  ;;  %s181_s0 = sand.u32 (!%p1070_p5), 1, %s890_s13  }
  0x45   : > { %s614_s7 = smul.u32 (!%p1070_p5), 24, %s181_s0  ;;  %s182_s27 = scalar_lea.sflag (!%p1070_p5), [#allocation8], %s181_s0 }
  0x47   : > { %s185_s8 = scalar_lea.vmem (!%p1070_p5), [#allocation7], %s614_s7 }
  0x49   : > { %861 = dma.done.wait (%p1014_p7), %s182_s27, 384  }
  0x4a   : > { %863 = vsyncadd (%p1014_p7), %s182_s27, 4294966912  ;;  %s191_s14 = scalar_lea.sflag [#allocation11], %s181_s0  ;;  %s194_s30 = scalar_lea.vmem [#allocation10], %s614_s7 }
  0x4b   : > { %865 = dma.done.wait (%p1014_p7), %s191_s14, 384  }
  0x4c   : > { %867 = vsyncadd (%p1014_p7), %s191_s14, 4294966912  ;;  %s217_s17 = sand.u32 1, %s878_s10   ;;  %v220_v0 = vld [vmem:[%s185_s8] sm:$0xff]  ;;  %v600_v1 = vld [vmem:[%s185_s8 + $0x8] sm:$0xff]  ;;  %p290_p7 = scmp.eq.s32.totalorder %s898_s15, 0  ;;  %v262_v38 = vlaneseq }
  0x4d   : > { %v601_v2 = vld [vmem:[%s185_s8 + $0x10] sm:$0xff]  ;;  %s1100_s5 = sshll.u32 %s217_s17, 3  ;;  %v230_v3 = vmul.f32 0.299, %v220_v0  ;;  %v231_v4 = vmul.f32 0.587, %v600_v1  ;;  %v247_v6 = vmul.f32 %v220_v0, %v220_v0  ;;  %v248_v7 = vmul.f32 %v600_v1, %v600_v1 }
  0x4e   : > { %v233_v5 = vmul.f32 0.114, %v601_v2  ;;  %v250_v8 = vmul.f32 %v601_v2, %v601_v2  ;;  %v225_v9 = vld [vmem:[%s194_s30] sm:$0xff]  ;;  %v602_v10 = vld [vmem:[%s194_s30 + $0x8] sm:$0xff]  ;;  %v603_v11 = vld [vmem:[%s194_s30 + $0x10] sm:$0xff]  ;;  %s921_s28 = smov 127  }
  0x4f   : > { %v232_v12 = vadd.f32 %v231_v4, %v230_v3  ;;  %v235_v13 = vmul.f32 0.299, %v225_v9  ;;  %v236_v14 = vmul.f32 0.587, %v602_v10  ;;  %v238_v15 = vmul.f32 0.114, %v603_v11 }
  0x50   : > { %v249_v16 = vadd.f32 %v248_v7, %v247_v6  ;;  %v242_v17 = vmul.f32 %v225_v9, %v220_v0  ;;  %v243_v18 = vmul.f32 %v602_v10, %v600_v1  ;;  %v245_v19 = vmul.f32 %v603_v11, %v601_v2  ;;  %s922_s20 = smov 1   ;;  %s219_s21 = scalar_lea.vmem [#allocation12], %s1100_s5 }
  0x51   : > { %v234_v20 = vadd.f32 %v233_v5, %v232_v12  ;;  %v237_v21 = vadd.f32 %v236_v14, %v235_v13  ;;  %v252_v22 = vmul.f32 %v225_v9, %v225_v9  ;;  %v253_v23 = vmul.f32 %v602_v10, %v602_v10  ;;  %p604_p4 = scmp.ne.s32.totalorder %s898_s15, 0 }
  0x52   : > { %v251_v24 = vadd.f32 %v250_v8, %v249_v16  ;;  %v244_v25 = vadd.f32 %v243_v18, %v242_v17  ;;  %v255_v26 = vmul.f32 %v603_v11, %v603_v11  ;;  %v263_v39 = vand.u32 127, %v262_v38 }
  0x53   : > { %271 = vrot.lane.b32.xlu1 %v234_v20, %s921_s28  ;;  %266 = vrot.lane.b32.xlu0 %v234_v20, %s922_s20  ;;  %v239_v27 = vadd.f32 %v238_v15, %v237_v21  ;;  %v254_v28 = vadd.f32 %v253_v23, %v252_v22  ;;  %v277_v40 = vadd.f32 %v234_v20, %v234_v20 }
  0x54   : > { %v246_v29 = vadd.f32 %v245_v19, %v244_v25  ;;  %vm265_vm0 = vcmp.eq.s32.totalorder %v263_v39, 127  ;;  %vm264_vm1 = vcmp.eq.s32.totalorder %v263_v39, 0 }
  0x55   : > { %v256_v30 = vadd.f32 %v255_v26, %v254_v28  ;;  %v240_v31 = vsub.f32 %v234_v20, %v239_v27  ;;  %v287_v47 = vadd.f32 %v239_v27, %v239_v27 }
  0x57   : > { %v257_v32 = vmul.f32 %v256_v30, %v251_v24  ;;  %283 = vrot.lane.b32.xlu1 %v239_v27, %s921_s28  ;;  %v1103_v33 = vand.u32 2147483647, %v240_v31  ;;  %280 = vrot.lane.b32.xlu0 %v239_v27, %s922_s20 }
  0x59   : > { %v258_v34 = vmax.f32 %v257_v32, 1e-24 }
  0x5b   : > { %732 = vrsqrt.f32 %v258_v34 }
  0x68   : > { %v733_v35 = vpop.eup %732 }
  0x69   : > { %v260_v36 = vmul.f32 %v733_v35, %v246_v29 }
  0x6b   : > { %v261_v37 = vsub.f32 1.0, %v260_v36 }
  0xc5   : > { %v272_v41 = vpop.permute.xlu1 %271  ;;  %v267_v42 = vpop.permute.xlu0 %266 }
  0xc6   : > { %v275_v43 = vsel %vm265_vm0, %v234_v20, %v272_v41  ;;  %v270_v44 = vsel %vm264_vm1, %v234_v20, %v267_v42 }
  0xc7   : > { %v1105_v45 = vsub.f32 %v275_v43, %v270_v44  ;;  %v278_v46 = vadd.f32 %v277_v40, %v270_v44 }
  0xc9   : > { %v1107_v48 = vadd.f32 %v278_v46, %v275_v43  ;;  %v284_v49 = vpop.permute.xlu1 %283  ;;  %v281_v50 = vpop.permute.xlu0 %280  ;;  %293 = sbr.rel (%p604_p4) target bundleno = 214 (0xd6), region = 40 }
  0xca   : > { %v285_v51 = vsel %vm265_vm0, %v239_v27, %v284_v49  ;;  %v282_v52 = vsel %vm264_vm1, %v239_v27, %v281_v50 }
  0xcb   : > { %v1109_v53 = vsub.f32 %v285_v51, %v282_v52  ;;  %v288_v54 = vadd.f32 %v287_v47, %v282_v52 }
  0xcd   : > { %v1111_v55 = vadd.f32 %v288_v54, %v285_v51 }
  0xce   : > { %v296_v56 = vshrl.u32 %v262_v38, 7  ;;  %v923_v57 = vmov 0.0  }
  0xcf   : > { %294 = vst [vmem:[#allocation2] sm:$0xff] %v923_v57 }
  0xd0   : > { %v297_v58 = vsub.s32 0, %v296_v56 }
  0xd2   : > { %v298_v59 = vrot.slane %v1105_v45, %v297_v58  ;;  %v303_v60 = vrot.slane %v1107_v48, %v297_v58  ;;  %v308_v61 = vrot.slane %v1109_v53, %v297_v58  ;;  %v313_v62 = vrot.slane %v1111_v55, %v297_v58 }
  0xd4   : > { %299 = vst [vmem:[#allocation3] sm:$0x3] %v298_v59  ;;  %304 = vst [vmem:[#allocation4] sm:$0x3] %v303_v60 }
  0xd5   : > { %309 = vst [vmem:[#allocation5] sm:$0x3] %v308_v61  ;;  %314 = vst [vmem:[#allocation6] sm:$0x3] %v313_v62 }
  0xd6 PF: > { %v315_v63 = vrot.slane %v1105_v45, 7  ;;  %v316_v0 = vrot.slane %v1105_v45, 6  ;;  %v317_v1 = vrot.slane %v1107_v48, 6  ;;  %v318_v2 = vrot.slane %v1109_v53, 7  ;;  %s370_s24 = scalar_select %p290_p7, 0.0, 1.0 }
  0xd7   : > { %v319_v3 = vrot.slane %v1109_v53, 6  ;;  %v320_v4 = vrot.slane %v1111_v55, 6  ;;  %v338_v5 = vmul.f32 10.0, %v261_v37  ;;  %v373_v19 = vadd.f32 %v1105_v45, %v1105_v45  ;;  %p605_p3 = scmp.ne.s32.totalorder %s898_s15, 3 }
  0xd8   : > { %v321_v7 = vadd.f32 %v315_v63, %v315_v63  ;;  %v324_v8 = vsub.f32 %v1107_v48, %v317_v1  ;;  %v325_v9 = vadd.f32 %v318_v2, %v318_v2  ;;  %v383_v32 = vadd.f32 %v1109_v53, %v1109_v53 }
  0xd9   : > { %v328_v13 = vsub.f32 %v1111_v55, %v320_v4  ;;  %v376_v41 = vrot.slane %v1105_v45, 1  ;;  %v386_v54 = vrot.slane %v1109_v53, 1  ;;  %v339_v63 = vadd.f32 %v338_v5, %v1103_v33 }
  0xda   : > { %v322_v20 = vadd.f32 %v321_v7, %v316_v0  ;;  %v326_v21 = vadd.f32 %v325_v9, %v319_v3  ;;  %v333_v22 = vand.u32 2147483647, %v324_v8  ;;  %vm408_vm2 = vcmask 1040384  }
  0xdb   : > { %v345_v6 = vld [vmem:[#allocation3] sm:$0x1]  ;;  %v346_v10 = vld [vmem:[#allocation3 + $0x1] sm:$0x1]  ;;  %v347_v11 = vld [vmem:[#allocation4] sm:$0x1] }
  0xdc   : > { %v348_v12 = vld [vmem:[#allocation4 + $0x1] sm:$0x1]  ;;  %v349_v14 = vld [vmem:[#allocation5] sm:$0x1]  ;;  %v350_v15 = vld [vmem:[#allocation5 + $0x1] sm:$0x1]  ;;  %v353_v17 = vadd.f32 %v346_v10, %v346_v10  ;;  %v356_v18 = vsub.f32 %v1107_v48, %v347_v11  ;;  %v323_v29 = vadd.f32 %v322_v20, %v1105_v45  ;;  %v327_v30 = vadd.f32 %v326_v21, %v1109_v53 }
  0xdd   : > { %v351_v16 = vld [vmem:[#allocation6] sm:$0x1]  ;;  %415 = vst [vmem:[#allocation3] sm:$0x3] %v316_v0  ;;  %416 = vst [vmem:[#allocation4] sm:$0x3] %v317_v1  ;;  %v357_v24 = vadd.f32 %v350_v15, %v350_v15  ;;  %v374_v37 = vadd.f32 %v373_v19, %v346_v10  ;;  %v384_v51 = vadd.f32 %v383_v32, %v350_v15  ;;  %v371_v11 = vstv %s370_s24 }
  0xde   : > { %v352_v23 = vld [vmem:[#allocation6 + $0x1] sm:$0x1]  ;;  %417 = vst [vmem:[#allocation5] sm:$0x3] %v319_v3  ;;  %v334_v25 = vand.u32 2147483647, %v328_v13  ;;  %v354_v26 = vadd.f32 %v353_v17, %v345_v6  ;;  %v360_v27 = vsub.f32 %v1111_v55, %v351_v16 }
  0xdf   : > { %v365_v28 = vand.u32 2147483647, %v356_v18  ;;  %418 = vst [vmem:[#allocation6] sm:$0x3] %v320_v4  ;;  %v358_v31 = vadd.f32 %v357_v24, %v349_v14  ;;  %v329_v38 = vand.u32 2147483647, %v323_v29  ;;  %v378_v50 = vadd.f32 %v376_v41, %v374_v37 }
  0xe0   : > { %v335_v34 = vsub.f32 %v333_v22, %v334_v25  ;;  %v355_v35 = vadd.f32 %v354_v26, %v1105_v45  ;;  %v366_v36 = vand.u32 2147483647, %v360_v27  ;;  %v330_v39 = vand.u32 2147483647, %v327_v30 }
  0xe1   : > { %v359_v40 = vadd.f32 %v358_v31, %v1109_v53  ;;  %v380_v46 = vrot.slane %v348_v12, 7  ;;  %v390_v56 = vrot.slane %v352_v23, 7  ;;  %v388_v59 = vadd.f32 %v386_v54, %v384_v51 }
  0xe2   : > { %v336_v42 = vand.u32 2147483647, %v335_v34  ;;  %v361_v43 = vand.u32 2147483647, %v355_v35  ;;  %v367_v44 = vsub.f32 %v365_v28, %v366_v36  ;;  %v331_v47 = vsub.f32 %v329_v38, %v330_v39 }
  0xe3   : > { %v362_v49 = vand.u32 2147483647, %v359_v40  ;;  %v382_v52 = vsub.f32 %v1107_v48, %v380_v46  ;;  %v392_v60 = vsub.f32 %v1111_v55, %v390_v56  ;;  %v393_v45 = vand.u32 2147483647, %v378_v50  ;;  %v342_v48 = vld [vmem:[#allocation2] sm:$0xff] }
  0xe4   : > { %v332_v57 = vand.u32 2147483647, %v331_v47  ;;  %v368_v0 = vand.u32 2147483647, %v367_v44  ;;  %v394_v2 = vand.u32 2147483647, %v388_v59 }
  0xe5   : > { %v363_v58 = vsub.f32 %v361_v43, %v362_v49  ;;  %v397_v61 = vand.u32 2147483647, %v382_v52  ;;  %v398_v3 = vand.u32 2147483647, %v392_v60 }
  0xe6   : > { %v337_v62 = vadd.f32 %v336_v42, %v332_v57  ;;  %v395_v53 = vsub.f32 %v393_v45, %v394_v2 }
  0xe7   : > { %v364_v1 = vand.u32 2147483647, %v363_v58  ;;  %v399_v6 = vsub.f32 %v397_v61, %v398_v3 }
  0xe8   : > { %v340_v4 = vmul.f32 2.0, %v337_v62  ;;  %v396_v9 = vand.u32 2147483647, %v395_v53 }
  0xe9   : > { %v369_v8 = vadd.f32 %v368_v0, %v364_v1  ;;  %v400_v10 = vand.u32 2147483647, %v399_v6 }
  0xea   : > { %v341_v7 = vadd.f32 %v340_v4, %v339_v63 }
  0xeb   : > { %v402_v12 = vrot.slane %v400_v10, 1  ;;  %v372_v13 = vmul.f32 %v371_v11, %v369_v8 }
  0xec   : > { %v343_v55 = vadd.f32 %v342_v48, %v341_v7 }
  0xed   : > { %v404_v33 = vadd.f32 %v402_v12, %v396_v9 }
  0xee   : > { %344 = vst [vmem:[#allocation2] sm:$0xff] %v343_v55 }
  0xef   : > { %v406_v5 = vrot.slane %v404_v33, 7 }
  0xf1   : > { %v409_v14 = vsel %vm408_vm2, %v372_v13, %v406_v5 }
  0xf2   : > { %v411_v15 = vsub.f32 %v409_v14, %v337_v62 }
  0xf4   : > { %v412_v17 = vmul.f32 2.0, %v411_v15  ;;  %422 = sbr.rel (%p605_p3) target bundleno = 471 (0x1d7), region = 44 }
  0xf5   : > { %v410_v16 = vld [vmem:[#allocation2] sm:$0x3] }
  0xf6   : > { %v413_v18 = vadd.f32 %v412_v17, %v410_v16 }
  0xf8   : > { %414 = vst [vmem:[#allocation2] sm:$0x3] %v413_v18 }
  0xf9   : > { %v433_v20 = vld [vmem:[#allocation3] sm:$0x1]  ;;  %v434_v21 = vld [vmem:[#allocation3 + $0x1] sm:$0x1]  ;;  %v437_v23 = vld [vmem:[#allocation4 + $0x1] sm:$0x1] }
  0xfa   : > { %v435_v22 = vmul.f32 3.0, %v434_v21  ;;  %v438_v24 = vld [vmem:[#allocation4] sm:$0x1]  ;;  %v440_v26 = vld [vmem:[#allocation5] sm:$0x1] }
  0xfb   : > { %v439_v25 = vsub.f32 %v437_v23, %v438_v24  ;;  %v441_v27 = vld [vmem:[#allocation5 + $0x1] sm:$0x1]  ;;  %v444_v28 = vld [vmem:[#allocation6 + $0x1] sm:$0x1]  ;;  %v445_v31 = vld [vmem:[#allocation6] sm:$0x1] }
  0xfc   : > { %v436_v29 = vadd.f32 %v435_v22, %v433_v20  ;;  %v442_v30 = vmul.f32 3.0, %v441_v27  ;;  %v446_v32 = vsub.f32 %v444_v28, %v445_v31 }
  0xfd   : > { %v451_v34 = vand.u32 2147483647, %v439_v25 }
  0xfe   : > { %v443_v35 = vadd.f32 %v442_v30, %v440_v26  ;;  %v447_v36 = vand.u32 2147483647, %v436_v29  ;;  %v452_v37 = vand.u32 2147483647, %v446_v32 }
  0xff   : > { %v423_v19 = vld [vmem:[#allocation2] sm:$0xff] }
 0x100   : > { %424 = vadd.xlane.f32.xlu0 %v423_v19  ;;  %v448_v38 = vand.u32 2147483647, %v443_v35  ;;  %v453_v39 = vsub.f32 %v451_v34, %v452_v37 }
 0x102   : > { %v449_v40 = vsub.f32 %v447_v36, %v448_v38  ;;  %v454_v41 = vand.u32 2147483647, %v453_v39 }
 0x104   : > { %v450_v42 = vand.u32 2147483647, %v449_v40 }
 0x106   : > { %v455_v43 = vadd.f32 %v454_v41, %v450_v42 }
 0x108   : > { %v456_v44 = vsel %vm408_vm2, %v455_v43, 0.0 }
 0x109   : > { %457 = vadd.xlane.f32.xlu0 %v456_v44 }
 0x189   : > { %v425_v46 = vpop.xlane.xlu0 %424 }
 0x18a   : > { %v426_v47 = vrot.slane %v425_v46, 4 }
 0x18c   : > { %v427_v49 = vadd.f32 %v426_v47, %v425_v46 }
 0x18e   : > { %v428_v50 = vrot.slane %v427_v49, 2 }
 0x190   : > { %v429_v51 = vadd.f32 %v428_v50, %v427_v49 }
 0x192   : > { %v430_v52 = vrot.slane %v429_v51, 1  ;;  %v458_v56 = vpop.xlane.xlu0 %457 }
 0x193   : > { %v459_v57 = vrot.slane %v458_v56, 4 }
 0x194   : > { %v431_v54 = vadd.f32 %v430_v52, %v429_v51 }
 0x195   : > { %v460_v58 = vadd.f32 %v459_v57, %v458_v56 }
 0x196   : > { %615 = vpush %v431_v54 }
 0x197   : > { %v461_v59 = vrot.slane %v460_v58, 2 }
 0x199   : > { %v462_v60 = vadd.f32 %v461_v59, %v460_v58 }
 0x19b   : > { %v463_v45 = vrot.slane %v462_v60, 1 }
 0x19d   : > { %v464_v61 = vadd.f32 %v463_v45, %v462_v60 }
 0x19f   : > { %617 = vpush %v464_v61 }
 0x1c7   : > { %s616_s15 = spop %615 }
 0x1d0   : > { %s618_s29 = spop %617 }
 0x1d1   : > { %s466_s18 = smul.f32 2.0, %s618_s29 }
 0x1d3   : > { %s467_s26 = sadd.f32 %s616_s15, %s466_s18 }
 0x1d5   : > { %v468_v62 = vstv %s467_s26 }
 0x1d6   : > { %469 = vst [vmem:[%s219_s21] sm:$0xff] %v468_v62 }
 0x1d7 PF: > { %s607_s12 = sshll.u32 %s902_s16, 7  ;;  %s484_s0 = sshll.u32 %s219_s21, 4  ;;  %s485_s0 = int_to_ptr.vmem [resolvable:$true] %s484_s0 }
 0x1d8   : > { %s482_s25 = scalar_lea.hbm %s1208_s2, %s607_s12  ;;  %s471_s7 = scalar_lea.sflag [#allocation9], %s217_s17 }
 0x1d9   : > { %s790_s27 = scalar_lea.vmem %s485_s0, 128  ;;  %s924_s8 = smov [#allocation12]  }
 0x1da   : > { %p791_p1 = scmp.ne.s32.totalorder %s485_s0, %s790_s27  ;;  %s794_s14 = sshll.u32 %s924_s8, 4  ;;  %s795_s14 = int_to_ptr.vmem [resolvable:$false] %s794_s14 }
 0x1db   : > { %s796_s30 = scalar_lea.vmem %s795_s14, 256  ;;  %p797_p8 = scmp.lt.s32.totalorder %s485_s0, %s795_s14 }
 0x1dc   : > { %p792_p5 = pnand %p791_p1, %p1022_p12  ;;  %p798_p9 = scmp.lt.s32.totalorder %s796_s30, %s790_s27 }
 0x1de   : > { %p793_p6 = pneg %p792_p5  ;;  %p799_p10 = por %p798_p9, %p797_p8 }
 0x1e0   : > { %p800_p11 = pnand %p799_p10, %p793_p6 }
 0x1e2   : > { %803 = shalt.err (!%p800_p11)
}
 0x1e3   : > { %s804_s16 = scalar_lea.hbm %s482_s25, 128  ;;  %s808_s28 = scalar_lea.hbm %s1208_s2, 256 }
 0x1e4   : > { %p805_p13 = scmp.ne.s32.totalorder %s482_s25, %s804_s16  ;;  %p809_p4 = scmp.lt.s32.totalorder %s482_s25, %s1208_s2 }
 0x1e5   : > { %p810_p3 = scmp.lt.s32.totalorder %s808_s28, %s804_s16 }
 0x1e6   : > { %p806_p0 = pnand %p805_p13, %p1022_p12 }
 0x1e7   : > { %p811_p1 = por %p810_p3, %p809_p4 }
 0x1e8   : > { %p807_p7 = pneg %p806_p0 }
 0x1ea   : > { %p812_p5 = pnand %p811_p1, %p807_p7 }
 0x1ec   : > { %815 = shalt.err (!%p812_p5)
}
 0x1ed   : > { %623 = dma.vmem_to_hbm [thread:$0]  (%p1022_p12), %s485_s0, 128, %s482_s25, %s471_s7  }
 0x1ee PF: > { %p637_p6 = scmp.ge.s32.totalorder %s914_s19, 2  ;;  %s496_s24 = sand.u32 1, %s874_s9  }
 0x1ef   : > { %s497_s15 = scalar_lea.sflag [#allocation9], %s496_s24 }
 0x1f0   : > { %p633_p8 = pnand %p637_p6, %p1035_p2 }
 0x1f2   : > { %p634_p9 = pneg %p633_p8 }
 0x1f4   : > { %869 = dma.done.wait (%p634_p9), %s497_s15, 128  }
 0x1f5   : > { %871 = vsyncadd (%p634_p9), %s497_s15, 4294967168  ;;  %s21_s19 = sadd.s32 1, %s914_s19   ;;  %s1230_s3 = sld [smem:[#allocation16_spill]] }
 0x1f6   : > { %p18_p10 = scmp.ge.s32.totalorder %s21_s19, 10   ;;  %s1231_s14 = sld [smem:[#allocation21_spill]] }
 0x1f7   : > { %s1232_s15 = sld [smem:[#allocation17_spill]]  ;;  %s1236_s9 = smov %s878_s10 }
 0x1f8   : > { %s1233_s16 = sld [smem:[#allocation18_spill]]  ;;  %s1237_s10 = smov %s882_s11 }
 0x1f9   : > { %s1234_s17 = sld [smem:[#allocation19_spill]]  ;;  %s1238_s11 = smov %s1027_s4 }
 0x1fa   : > { %s1235_s18 = sld [smem:[#allocation20_spill]]  ;;  %s1239_s12 = smov %s890_s13 }
 0x1fb   : > { %s1240_s13 = smov %s1230_s3  ;;  %20 = sbr.rel (!%p18_p10) target bundleno = 13 (0xd), region = 98 }
 0x200   :  { %502 = vsyncpa [#allocation8], 1 }
 0x201   :  { %504 = vsyncpa [#allocation8 + $0x1], 1 }
 0x202   :  { %505 = vsyncpa [#allocation11], 1 }
 0x203   :  { %507 = vsyncpa [#allocation11 + $0x1], 1 }
 0x204   :  { %508 = vsyncpa [#allocation9], 1 }
 0x205   :  { %510 = vsyncpa [#allocation9 + $0x1], 1 }

</bundles_post_ra>
